<compile_context>
chip_gen: v7x
topology: tpu7x:2x2x1
jax: 0.10.0
libtpu: 0.0.40
codegen_flags: <defaults>
</compile_context>

<pallas_src>
import functools

import jax
import jax.numpy as jnp
from jax.experimental import pallas as pl
from jax.experimental.pallas import tpu as pltpu


_FAST_PATH_BYTES = 1 << 20      # below this, pallas_call launch overhead dominates


def _cdiv(a, b):
    return -(-a // b)


def _round_up(a, b):
    return _cdiv(a, b) * b


def _vmem_capacity_bytes():
    """Best-effort per-core VMEM capacity; falls back to v7x's 64 MiB."""
    try:
        info = pltpu.get_tpu_info()
        cap = int(getattr(info, "vmem_capacity_bytes", 0) or 0)
        if cap > 0:
            return cap
    except Exception:
        pass
    return 64 * 1024 * 1024


def _superfeat_kernel(x_ref, sum_ref, cnt_ref, *, D, g, Dp, tr, tps,
                      n_valid_rows, first_masked_tile, num_tiles):
    """Accumulates sum(x*x) and count(original rows with any nonzero elem)."""
    p = pl.program_id(0)        # split index (one per TensorCore on v7x)
    j = pl.program_id(1)        # row-tile index within the split (reduction)
    tile_idx = p * tps + j

    @pl.when(j == 0)
    def _():
        sum_ref[...] = jnp.zeros_like(sum_ref)
        cnt_ref[...] = jnp.zeros_like(cnt_ref)

    x = x_ref[...].astype(jnp.float32)                       # (tr, Dp)
    sq = x * x

    def accumulate(sq_tile):
        n64 = tr // 64
        # ---- sum: exact f32, two-stage tree-add (8-way vadd ILP) -----------
        part64 = jnp.sum(sq_tile.reshape(n64, 64, Dp), axis=0)       # (64, Dp)
        if Dp == 128:
            sum_ref[...] += jnp.sum(part64.reshape(8, 8, 128), axis=0)
        else:
            sum_ref[...] += jnp.sum(part64)

        # ---- count: rows with any nonzero element --------------------------
        # NOTE: a row is counted iff any x*x > 0 in f32; this matches the
        # PyTorch `row != 0` check except when the scaled f32 row mean
        # underflows to exactly 0 (extreme edge case, consciously accepted).
        if g > 1:
            # {0,1} bf16 indicator x block-diagonal bf16 selector: one
            # default-precision MXU pass gives per-original-row counts.
            ind = (sq_tile > 0.0).astype(jnp.bfloat16)                # (tr, 128)
            lane = jax.lax.broadcasted_iota(jnp.int32, (Dp, g), 0)
            grp = jax.lax.broadcasted_iota(jnp.int32, (Dp, g), 1)
            sel = ((lane >= grp * D) & (lane < (grp + 1) * D)
                   ).astype(jnp.bfloat16)                             # (128, g)
            per_row = jnp.dot(ind, sel,
                              preferred_element_type=jnp.float32)     # (tr, g)
        else:
            per_row = jnp.sum(sq_tile, axis=-1, keepdims=True)        # (tr, 1)
        nz = (per_row > 0.0).astype(jnp.float32)
        nz64 = jnp.sum(nz.reshape(n64, 64, nz.shape[-1]), axis=0)
        cnt_ref[...] += jnp.sum(nz64)

    if first_masked_tile >= num_tiles:
        # Every tile is full: no masking anywhere (hot path everywhere).
        accumulate(sq)
    else:
        # Only trailing tile(s) contain rows past the array.  Gate the
        # full-tile iota/compare/select behind pl.when so every full tile
        # skips it at runtime (cold path taken by at most one tile per split).
        @pl.when(tile_idx < first_masked_tile)
        def _():
            accumulate(sq)

        @pl.when(tile_idx >= first_masked_tile)
        def _():
            rid = (jax.lax.broadcasted_iota(jnp.int32, sq.shape, 0)
                   + tile_idx * tr)
            # True select: garbage/NaN in the padded region cannot leak.
            accumulate(jnp.where(rid < n_valid_rows, sq, 0.0))


def _loss_ref_impl(x):
    row = jnp.mean(x.astype(jnp.float32) ** 2, axis=-1) / 1024.0
    mask = (row != 0.0).astype(jnp.float32)
    s = jnp.sum(row)
    c = jnp.sum(mask)
    return jnp.where(c != 0.0, s / jnp.where(c != 0.0, c, 1.0), s)


def superfeat_loss(acc_diff, *, use_fast_path=True):
    """Pallas implementation of SuperFeat.forward. Returns (loss, aux_dict)."""
    if acc_diff.size == 0:
        loss = jnp.float32(0.0)
        return loss, {"L2 diff Loss": loss}

    D = acc_diff.shape[-1]
    x = acc_diff.reshape(-1, D)
    R = x.shape[0]
    elem_bytes = jnp.dtype(x.dtype).itemsize

    # Tiny inputs: kernel launch + DMA setup overhead dominates -> plain XLA.
    if use_fast_path and R * D * elem_bytes < _FAST_PATH_BYTES:
        loss = _loss_ref_impl(x)
        return loss, {"L2 diff Loss": loss}

    # --- lane-dense packing: view (R, D) as (R/g, 128) when possible --------
    if D < 128 and 128 % D == 0 and R % (128 // D) == 0:
        g = 128 // D
    else:
        # TODO(synk): zero-pad D to the next divisor of 128 for small
        # non-dividing D so those shapes get lane-dense vregs too.
        g = 1
    Dp = D * g
    Rp = R // g
    xp = x.reshape(Rp, Dp)

    # Zero rows contribute nothing to either accumulator, so small inputs can
    # be row-padded for free (guarantees tr % 64 == 0 and tr <= Rp).
    if Rp < 128:
        xp = jnp.concatenate([xp, jnp.zeros((128 - Rp, Dp), xp.dtype)], axis=0)
        Rp = 128

    # --- generation-aware block sizing ---------------------------------------
    vmem_cap = _vmem_capacity_bytes()
    if vmem_cap >= 100 * 1024 * 1024:         # v5e / v6e class (128 MiB VMEM)
        target_block_bytes = 16 * 1024 * 1024
        vmem_limit = 96 * 1024 * 1024
    else:                                      # v7x class (64 MiB per core)
        target_block_bytes = 10 * 1024 * 1024
        vmem_limit = 48 * 1024 * 1024
    target_tr = max(64, (target_block_bytes // (Dp * elem_bytes)) // 64 * 64)

    # --- balanced tiling + forced 2-way split --------------------------------
    nsplit = 2                                 # per-split output block; shards
    num_tiles = _round_up(max(_cdiv(Rp, target_tr), nsplit), nsplit)
    tr = _round_up(_cdiv(Rp, num_tiles), 64)   # balanced: both splits ~equal
    tps = num_tiles // nsplit
    last_real_block = _cdiv(Rp, tr) - 1
    first_masked_tile = Rp // tr               # first tile with rows >= Rp

    kernel = functools.partial(
        _superfeat_kernel, D=D, g=g, Dp=Dp, tr=tr, tps=tps,
        n_valid_rows=Rp, first_masked_tile=first_masked_tile,
        num_tiles=num_tiles)

    def x_index_map(p, j):
        # Clamp keeps (rare) fully-phantom trailing tiles in bounds; they are
        # zero-masked inside the kernel anyway.
        return (jnp.minimum(p * tps + j, last_real_block), 0)

    sum_out, cnt_out = pl.pallas_call(
        kernel,
        out_shape=(
            jax.ShapeDtypeStruct((nsplit * 8, 128), jnp.float32),
            jax.ShapeDtypeStruct((nsplit * 8, 128), jnp.float32),
        ),
        grid_spec=pltpu.PrefetchScalarGridSpec(
            num_scalar_prefetch=0,
            grid=(nsplit, tps),
            in_specs=[pl.BlockSpec((tr, Dp), x_index_map)],
            out_specs=(
                pl.BlockSpec((8, 128), lambda p, j: (p, 0)),
                pl.BlockSpec((8, 128), lambda p, j: (p, 0)),
            ),
        ),
        compiler_params=pltpu.CompilerParams(
            # TODO(synk): on v7x verify this axis shards across both
            # TensorCores in the bundle dump; if not, switch it to
            # pltpu.CORE_PARALLEL.
            dimension_semantics=("parallel", "arbitrary"),
            vmem_limit_bytes=vmem_limit,
        ),
    )(xp)

    inv_scale = 1.0 / (float(D) * 1024.0)
    total = jnp.sum(sum_out) * inv_scale
    # Each split's cnt block holds that split's scalar count broadcast across
    # the whole (8,128) block; take one representative element per split.
    count = jnp.sum(cnt_out[0::8, 0])
    loss = jnp.where(count > 0.0, total / jnp.maximum(count, 1.0), total)
    return loss, {"L2 diff Loss": loss}


def superfeat_ref(acc_diff):
    """Pure-JAX reference mirroring the PyTorch module."""
    return _loss_ref_impl(acc_diff.reshape(-1, acc_diff.shape[-1]))


if __name__ == "__main__":
    k1, k2 = jax.random.split(jax.random.PRNGKey(0))

    # Small shape consistent with the module (batch=2, seq=8, hidden=32),
    # forced through the Pallas kernel, with explicit zero rows so the
    # nonzero-row mask logic is exercised.
    acc_small = jax.random.normal(k1, (2, 8, 32), dtype=jnp.float32)
    acc_small = acc_small.at[0, 3].set(0.0).at[1, 5].set(0.0)
    loss_s, _ = superfeat_loss(acc_small, use_fast_path=False)
    loss_s = jax.block_until_ready(loss_s)
    ref_s = superfeat_ref(acc_small)
    assert jnp.allclose(loss_s, ref_s, rtol=1e-4, atol=1e-6), (loss_s, ref_s)

    # Larger shape exercising lane packing, the balanced two-way split, and
    # the pl.when-gated masked partial trailing tile (Rp = 20001 packed rows).
    acc_big = jax.random.normal(k2, (2, 40002, 32), dtype=jnp.float32)
    acc_big = (acc_big.at[0, 123].set(0.0)
                      .at[1, 4567].set(0.0)
                      .at[1, 39999].set(0.0))
    loss_b, _ = superfeat_loss(acc_big)
    loss_b = jax.block_until_ready(loss_b)
    ref_b = superfeat_ref(acc_big)
    assert jnp.allclose(loss_b, ref_b, rtol=1e-4, atol=1e-6), (loss_b, ref_b)

    print("KERNEL_OK")
</pallas_src>

<mosaic_0001>
module attributes {stable_mosaic.version = 11 : i64} {
  func.func @_superfeat_kernel(%arg0: i32, %arg1: i32, %arg2: memref<64x128xf32, #tpu.memory_space<vmem>>, %arg3: memref<8x128xf32, #tpu.memory_space<vmem>>, %arg4: memref<8x128xf32, #tpu.memory_space<vmem>>) attributes {dimension_semantics = [#tpu.dimension_semantics<parallel>, #tpu.dimension_semantics<arbitrary>], iteration_bounds = array<i64: 2, 1>, scalar_prefetch = 0 : i64, scratch_operands = 0 : i64, tpu.core_type = #tpu.core_type<tc>, window_params = [{transform_indices = @transform_0, window_bounds = array<i64: 64, 128>}, {transform_indices = @transform_1, window_bounds = array<i64: 8, 128>}, {transform_indices = @transform_2, window_bounds = array<i64: 8, 128>}]} {
    %c0_i32 = arith.constant 0 : i32
    %0 = arith.cmpi eq, %arg1, %c0_i32 : i32
    %1 = arith.extui %0 : i1 to i32
    %c0_i32_0 = arith.constant 0 : i32
    %2 = arith.cmpi ne, %1, %c0_i32_0 : i32
    scf.if %2 {
      %cst_17 = arith.constant 0.000000e+00 : f32
      %46 = vector.broadcast %cst_17 : f32 to vector<8x128xf32>
      %c0_18 = arith.constant 0 : index
      %c0_19 = arith.constant 0 : index
      %47 = vector.load %arg3[%c0_18, %c0_19] : memref<8x128xf32, #tpu.memory_space<vmem>>, vector<8x128xf32>
      tpu.vector_store %arg3[%c0_18, %c0_19], %46 {strides = array<i32>} : memref<8x128xf32, #tpu.memory_space<vmem>>, vector<8x128xf32>,
      %cst_20 = arith.constant 0.000000e+00 : f32
      %48 = vector.broadcast %cst_20 : f32 to vector<8x128xf32>
      %c0_21 = arith.constant 0 : index
      %c0_22 = arith.constant 0 : index
      %49 = vector.load %arg4[%c0_21, %c0_22] : memref<8x128xf32, #tpu.memory_space<vmem>>, vector<8x128xf32>
      tpu.vector_store %arg4[%c0_21, %c0_22], %48 {strides = array<i32>} : memref<8x128xf32, #tpu.memory_space<vmem>>, vector<8x128xf32>,
    } else {
    }
    %c0 = arith.constant 0 : index
    %c0_1 = arith.constant 0 : index
    %3 = vector.load %arg2[%c0, %c0_1] : memref<64x128xf32, #tpu.memory_space<vmem>>, vector<64x128xf32>
    %4 = arith.mulf %3, %3 : vector<64x128xf32>
    %5 = vector.shape_cast %4 : vector<64x128xf32> to vector<1x64x128xf32>
    %cst = arith.constant dense<0.000000e+00> : vector<64x128xf32>
    %6 = vector.multi_reduction <add>, %5, %cst [0] : vector<1x64x128xf32> to vector<64x128xf32>
    %c0_2 = arith.constant 0 : index
    %c0_3 = arith.constant 0 : index
    %7 = vector.load %arg3[%c0_2, %c0_3] : memref<8x128xf32, #tpu.memory_space<vmem>>, vector<8x128xf32>
    %8 = vector.shape_cast %6 : vector<64x128xf32> to vector<8x8x128xf32>
    %cst_4 = arith.constant dense<0.000000e+00> : vector<8x128xf32>
    %9 = vector.multi_reduction <add>, %8, %cst_4 [0] : vector<8x8x128xf32> to vector<8x128xf32>
    %10 = arith.addf %7, %9 : vector<8x128xf32>
    %c0_5 = arith.constant 0 : index
    %c0_6 = arith.constant 0 : index
    %11 = vector.load %arg3[%c0_5, %c0_6] : memref<8x128xf32, #tpu.memory_space<vmem>>, vector<8x128xf32>
    tpu.vector_store %arg3[%c0_5, %c0_6], %10 {strides = array<i32>} : memref<8x128xf32, #tpu.memory_space<vmem>>, vector<8x128xf32>,
    %cst_7 = arith.constant 0.000000e+00 : f32
    %12 = vector.broadcast %cst_7 : f32 to vector<64x128xf32>
    %13 = arith.cmpf ogt, %4, %12 : vector<64x128xf32>
    %14 = arith.extui %13 : vector<64x128xi1> to vector<64x128xi32>
    %15 = arith.sitofp %14 : vector<64x128xi32> to vector<64x128xf32>
    %16 = arith.truncf %15 : vector<64x128xf32> to vector<64x128xbf16>
    %17 = tpu.iota {dimensions = array<i32: 0>} : vector<128x4xi32>
    %18 = tpu.iota {dimensions = array<i32: 1>} : vector<128x4xi32>
    %c32_i32 = arith.constant 32 : i32
    %19 = vector.broadcast %c32_i32 : i32 to vector<128x4xi32>
    %20 = arith.muli %18, %19 : vector<128x4xi32>
    %21 = arith.cmpi sge, %17, %20 : vector<128x4xi32>
    %c1_i32 = arith.constant 1 : i32
    %22 = vector.broadcast %c1_i32 : i32 to vector<128x4xi32>
    %23 = arith.addi %18, %22 : vector<128x4xi32>
    %c32_i32_8 = arith.constant 32 : i32
    %24 = vector.broadcast %c32_i32_8 : i32 to vector<128x4xi32>
    %25 = arith.muli %23, %24 : vector<128x4xi32>
    %26 = arith.cmpi slt, %17, %25 : vector<128x4xi32>
    %27 = arith.andi %21, %26 : vector<128x4xi1>
    %28 = arith.extui %27 : vector<128x4xi1> to vector<128x4xi32>
    %29 = arith.sitofp %28 : vector<128x4xi32> to vector<128x4xf32>
    %30 = arith.truncf %29 : vector<128x4xf32> to vector<128x4xbf16>
    %cst_9 = arith.constant dense<0.000000e+00> : vector<64x4xf32>
    %31 = tpu.matmul %16, %30, %cst_9 {dimension_numbers = #tpu.dot_dimension_numbers<[1], [0], [0], [1], [0, 0, 1, 1], [], []>} : vector<64x128xbf16>, vector<128x4xbf16>, vector<64x4xf32> -> vector<64x4xf32>
    %cst_10 = arith.constant 0.000000e+00 : f32
    %32 = vector.broadcast %cst_10 : f32 to vector<64x4xf32>
    %33 = arith.cmpf ogt, %31, %32 : vector<64x4xf32>
    %34 = arith.extui %33 : vector<64x4xi1> to vector<64x4xi32>
    %35 = arith.sitofp %34 : vector<64x4xi32> to vector<64x4xf32>
    %36 = vector.shape_cast %35 : vector<64x4xf32> to vector<1x64x4xf32>
    %cst_11 = arith.constant dense<0.000000e+00> : vector<64x4xf32>
    %37 = vector.multi_reduction <add>, %36, %cst_11 [0] : vector<1x64x4xf32> to vector<64x4xf32>
    %c0_12 = arith.constant 0 : index
    %c0_13 = arith.constant 0 : index
    %38 = vector.load %arg4[%c0_12, %c0_13] : memref<8x128xf32, #tpu.memory_space<vmem>>, vector<8x128xf32>
    %39 = vector.shape_cast %37 : vector<64x4xf32> to vector<1x64x4xf32>
    %cst_14 = arith.constant dense<0.000000e+00> : vector<1xf32>
    %40 = vector.multi_reduction <add>, %39, %cst_14 [1, 2] : vector<1x64x4xf32> to vector<1xf32>
    %41 = vector.shape_cast %40 : vector<1xf32> to vector<1x1x1xf32>
    %42 = vector.extract %41[0, 0, 0] : f32 from vector<1x1x1xf32>
    %43 = vector.broadcast %42 : f32 to vector<8x128xf32>
    %44 = arith.addf %38, %43 : vector<8x128xf32>
    %c0_15 = arith.constant 0 : index
    %c0_16 = arith.constant 0 : index
    %45 = vector.load %arg4[%c0_15, %c0_16] : memref<8x128xf32, #tpu.memory_space<vmem>>, vector<8x128xf32>
    tpu.vector_store %arg4[%c0_15, %c0_16], %44 {strides = array<i32>} : memref<8x128xf32, #tpu.memory_space<vmem>>, vector<8x128xf32>,
    return
  }
  func.func @transform_0(%arg0: i32, %arg1: i32) -> (i32, i32) {
    %c1_i32 = arith.constant 1 : i32
    %0 = arith.muli %arg0, %c1_i32 : i32
    %1 = arith.addi %0, %arg1 : i32
    %c1_i32_0 = arith.constant 1 : i32
    %2 = arith.minsi %1, %c1_i32_0 : i32
    %c0_i32 = arith.constant 0 : i32
    %c0_i32_1 = arith.constant 0 : i32
    return %2, %c0_i32 : i32, i32
  }
  func.func @transform_1(%arg0: i32, %arg1: i32) -> (i32, i32) {
    %c0_i32 = arith.constant 0 : i32
    %c0_i32_0 = arith.constant 0 : i32
    return %arg0, %c0_i32 : i32, i32
  }
  func.func @transform_2(%arg0: i32, %arg1: i32) -> (i32, i32) {
    %c0_i32 = arith.constant 0 : i32
    %c0_i32_0 = arith.constant 0 : i32
    return %arg0, %c0_i32 : i32, i32
  }
}

</mosaic_0001>

<bundles_post_ra>
// kernel: tpu_custom_call.1
= control target key start
LH: loop header
LB: loop body
LE: loop exit
PB: predicated region body
PF: predicated region fallthrough
CT: control target
= control target key end

     0   :  { %8 = vsyncpa [#allocation3], 0  ;;  %s1518_s0 = inlined_call_operand.hbm [shape: f32[128,128], index: 0, kind: input, shape index: {}]   ;;  %s1519_s1 = inlined_call_operand.hbm [shape: f32[16,128], index: 1, kind: output, shape index: {0}]   ;;  %s1520_s2 = inlined_call_operand.hbm [shape: f32[16,128], index: 2, kind: output, shape index: {1}]  }
   0x1   :  { %10 = vsyncpa [#allocation3 + $0x1], 0 }
   0x2   :  { %11 = vsyncpa [#allocation4], 0 }
   0x3   :  { %13 = vsyncpa [#allocation4 + $0x1], 0 }
   0x4   :  { %14 = vsyncpa [#allocation7], 0 }
   0x5   :  { %16 = vsyncpa [#allocation7 + $0x1], 0  ;;  %s1060_s9 = smov 0   ;;  %s1062_s10 = smov 0  }
   0x6   :  { %s1064_s11 = smov 0   ;;  %s1066_s12 = smov 0  }
   0x7   :  { %s1068_s13 = smov 0   ;;  %s1070_s14 = smov 0  }
   0x8   :  { %s1072_s15 = smov 0   ;;  %s1074_s16 = smov 0  }
   0x9   :  { %s1076_s17 = smov 0  }
   0xa LB: > { %s645_s18 = sadd.s32 4294967295, %s1036_s17   ;;  %s646_s19 = sadd.s32 4294967294, %s1036_s17   ;;  %s1036_s17 = sphi %s1076_s17, %s22_s17   ;;  %s1032_s16 = sphi %s1074_s16, %s1549_s16   ;;  %s1028_s15 = sphi %s1072_s15, %s1548_s15   ;;  %s1024_s14 = sphi %s1070_s14, %s1547_s14   ;;  %s1020_s13 = sphi %s1068_s13, %s1546_s13   ;;  %s1016_s12 = sphi %s1066_s12, %s1545_s12   ;;  %s1012_s11 = sphi %s1064_s11, %s1544_s11   ;;  %s1008_s10 = sphi %s1062_s10, %s1543_s10   ;;  %s1004_s9 = sphi %s1060_s9, %s1542_s9  }
   0xb   : > { %s34_s20 = sadd.s32 1, %s1032_s16  ;;  %p39_p0 = scmp.lt.s32.totalorder %s1032_s16, 1 }
   0xc   : > { %p36_p1 = scmp.ge.s32.totalorder %s34_s20, 2  ;;  %s47_s21 = sadd.s32 1, %s1024_s14 }
   0xd   : > { %s1109_s22 = scalar_select %p39_p0, %s1032_s16, 1 }
   0xe   : > { %s1551_s20 = smov (%p36_p1, %s34_s20), 0  ;;  %p54_p2 = scmp.ne.s32.totalorder %s1024_s14, %s1020_s13 }
   0xf   : > { %p55_p3 = scmp.eq.s32.totalorder %s1036_s17, 0  ;;  %p42_p4 = scmp.lt.s32.totalorder %s1551_s20, 1 }
  0x10   : > { %p60_p5 = scmp.ne.s32.totalorder %s1020_s13, %s1016_s12  ;;  %p61_p7 = scmp.eq.s32.totalorder %s645_s18, 0 }
  0x11   : > { %p1118_p6 = por %p55_p3, %p54_p2  ;;  %s70_s26 = ssub.s32 %s1032_s16, %s1551_s20 }
  0x12   : > { %s43_s24 = scalar_select %p42_p4, %s1551_s20, 1 }
  0x13   : > { %p1123_p8 = por %p61_p7, %p60_p5  ;;  %p71_p9 = scmp.eq.s32.totalorder %s70_s26, 0 }
  0x14   : > { %s44_s27 = ssub.s32 %s1109_s22, %s43_s24  ;;  %s73_s28 = sadd.s32 1, %s1012_s11 }
  0x15   : > { %p45_p10 = scmp.eq.s32.totalorder %s44_s27, 0  ;;  %p83_p11 = scmp.ne.s32.totalorder %s1012_s11, %s1008_s10 }
  0x16   : > { %s1132_s29 = scalar_select %p71_p9, %s1012_s11, %s73_s28  }
  0x17   : > { %s1135_s30 = scalar_select %p45_p10, %s1024_s14, %s47_s21  }
  0x18   : > { %p84_p12 = scmp.eq.s32.totalorder %s645_s18, 1  ;;  %p89_p13 = scmp.ne.s32.totalorder %s1008_s10, %s1004_s9 }
  0x19   : > { %p90_p0 = scmp.eq.s32.totalorder %s646_s19, 1  ;;  %p790_p4 = scmp.lt.s32.totalorder %s1036_s17, 2 }
  0x1a   : > { %p1141_p1 = por %p84_p12, %p83_p11  ;;  %s136_s5 = sand.u32 1, %s1024_s14  }
  0x1b   : > { %p1146_p3 = por %p90_p0, %p89_p13  ;;  %s718_s6 = sshll.u32 %s1109_s22, 10 }
  0x1c   : > { %s1524_s3 = scalar_select %p1141_p1, 1, 0 }
  0x1d   : > { %s1525_s4 = scalar_select %p1146_p3, 1, 0 }
  0x1e   : > { %s649_s7 = sshll.u32 %s136_s5, 6  ;;  %s1156_s21 = scalar_lea.hbm %s1518_s0, %s718_s6 }
  0x1f   : > { %s140_s18 = scalar_lea.vmem [#allocation2], %s649_s7  ;;  %p1160_p5 = pnand %p790_p4, %p1118_p6 }
  0x20   : > { %s150_s19 = sshll.u32 %s140_s18, 4  ;;  %s1166_s22 = scalar_lea.sflag [#allocation3], %s136_s5  ;;  %s1164_s19 = int_to_ptr.vmem [resolvable:$true] %s150_s19 }
  0x21   : > { %s868_s26 = scalar_lea.hbm %s1156_s21, 1024  ;;  %p870_p9 = pneg %p1160_p5 }
  0x22   : > { %p869_p7 = scmp.ne.s32.totalorder %s1156_s21, %s868_s26  ;;  %s873_s28 = scalar_lea.hbm %s1518_s0, 2048 }
  0x23   : > { %p874_p6 = scmp.lt.u32.totalorder %s1156_s21, %s1518_s0  ;;  %p875_p12 = scmp.lt.u32.totalorder %s873_s28, %s868_s26 }
  0x24   : > { %p871_p10 = pnand %p870_p9, %p869_p7  ;;  %p877_p0 = scmp.lt.u32.totalorder %s868_s26, %s1156_s21 }
  0x25   : > { %p876_p13 = por %p875_p12, %p874_p6 }
  0x26   : > { %p872_p11 = pneg %p871_p10 }
  0x27   : > { %p878_p4 = por %p877_p0, %p876_p13 }
  0x29   : > { %p879_p2 = pnand %p878_p4, %p872_p11 }
  0x2b   : > { %882 = shalt.err (!%p879_p2)
}
  0x2c   : > { %s883_s5 = scalar_lea.vmem %s1164_s19, 1024  ;;  %s1038_s8 = smov [#allocation2]  }
  0x2d   : > { %p884_p7 = scmp.ne.s32.totalorder %s1164_s19, %s883_s5  ;;  %s888_s12 = sshll.u32 %s1038_s8, 4  ;;  %s889_s12 = int_to_ptr.vmem [resolvable:$false] %s888_s12 }
  0x2e   : > { %s890_s18 = scalar_lea.vmem %s889_s12, 2048  ;;  %p891_p1 = scmp.lt.s32.totalorder %s1164_s19, %s889_s12 }
  0x2f   : > { %p886_p10 = pnand %p884_p7, %p870_p9  ;;  %p892_p6 = scmp.lt.s32.totalorder %s890_s18, %s883_s5 }
  0x31   : > { %p887_p3 = pneg %p886_p10  ;;  %p893_p12 = por %p892_p6, %p891_p1 }
  0x33   : > { %p894_p13 = pnand %p893_p12, %p887_p3 }
  0x35   : > { %897 = shalt.err (!%p894_p13)
}
  0x36   : > { %s1039_s26 = smov 128   ;;  %s1040_s27 = smov 8  }
  0x37   : > { %782 = dma.hbm_to_vmem [thread:$0]  (!%p1160_p5), %s1156_s21, 1024, %s1164_s19, %s1166_s22, %s1039_s26, %s1039_s26, %s1040_s27  }
  0x38   : > { %p652_p2 = scmp.ge.s32.totalorder %s1036_s17, 1  ;;  %p158_p9 = scmp.lt.s32.totalorder %s1036_s17, 3 }
  0x3a   : > { %p159_p11 = pnand %p652_p2, %p158_p9 }
  0x3b   : > { %s164_s23 = sand.u32 (!%p159_p11), 1, %s1020_s13   ;;  %v267_v0 = vlaneseq (!%p159_p11) }
  0x3c   : > { %162 = sbr.rel (%p159_p11) target bundleno = 561 (0x231), region = 24  ;;  %s653_s28 = sshll.u32 (!%p159_p11), %s164_s23, 6 }
  0x3d   : > { %s165_s6 = scalar_lea.sflag (!%p159_p11), [#allocation3], %s164_s23  ;;  %s1197_s7 = scalar_lea.vmem (!%p159_p11), [#allocation2], %s653_s28 }
  0x43   : > { %991 = dma.done.wait (%p1123_p8), %s165_s6, 1024  }
  0x44   : > { %993 = vsyncadd (%p1123_p8), %s165_s6, 4294966272  ;;  %v1203_v1 = vshrl.u32 %v267_v0, 7  ;;  %v285_v2 = vand.u32 127, %v267_v0  ;;  %v1041_v12 = vmov 1.0|1.0   ;;  %v205_v16 = vld [vmem:[%s1197_s7] sm:$0xff] }
  0x45   : > { %v206_v17 = vld [vmem:[%s1197_s7 + $0x8] sm:$0xff]  ;;  %v207_v20 = vld [vmem:[%s1197_s7 + $0x10] sm:$0xff]  ;;  %v1264_v22 = vmul.f32 %v205_v16, %v205_v16  ;;  %v208_v25 = vld [vmem:[%s1197_s7 + $0x18] sm:$0xff]  ;;  %v1042_v57 = vmov 0.0   ;;  %s1421_s25 = sand.u32 1, %s1008_s10   ;;  %s714_s24 = sshll.u32 %s1028_s15, 7 }
  0x46   : > { %v269_v3 = vadd.s32 8, %v1203_v1  ;;  %v1206_v4 = vmul.u32 32, %v285_v2  ;;  %v303_v5 = vadd.s32 1, %v285_v2  ;;  %v270_v6 = vadd.s32 16, %v1203_v1  ;;  %v209_v31 = vld [vmem:[%s1197_s7 + $0x20] sm:$0xff]  ;;  %v210_v34 = vld [vmem:[%s1197_s7 + $0x28] sm:$0xff]  ;;  %s1433_s12 = scalar_lea.hbm %s1519_s1, %s714_s24 }
  0x47   : > { %v271_v8 = vadd.s32 24, %v1203_v1  ;;  %v272_v9 = vadd.s32 32, %v1203_v1  ;;  %v273_v10 = vadd.s32 40, %v1203_v1  ;;  %v274_v11 = vadd.s32 48, %v1203_v1  ;;  %v211_v40 = vld [vmem:[%s1197_s7 + $0x30] sm:$0xff]  ;;  %v212_v44 = vld [vmem:[%s1197_s7 + $0x38] sm:$0xff] }
  0x48   : > { %vm287_vm0 = vcmp.ge.s32.totalorder %v1203_v1, %v1206_v4  ;;  %v1211_v7 = vmul.u32 32, %v303_v5  ;;  %vm288_vm1 = vcmp.ge.s32.totalorder %v269_v3, %v1206_v4  ;;  %vm289_vm5 = vcmp.ge.s32.totalorder %v270_v6, %v1206_v4  ;;  %s654_s21 = sshll.u32 %s1421_s25, 3  ;;  %s504_s18 = scalar_lea.sflag [#allocation4], %s1421_s25 }
  0x49   : > { %vm290_vm8 = vcmp.ge.s32.totalorder %v271_v8, %v1206_v4  ;;  %vm291_vm12 = vcmp.ge.s32.totalorder %v272_v9, %v1206_v4  ;;  %v275_v13 = vadd.s32 56, %v1203_v1  ;;  %vm292_vm15 = vcmp.ge.s32.totalorder %v273_v10, %v1206_v4  ;;  %s186_s19 = scalar_lea.vmem [#allocation5], %s654_s21  ;;  %p1539_p1 = scmp.ne.s32.totalorder %s1524_s3, 0 }
  0x4a   : > { %vm305_vm2 = vcmp.lt.s32.totalorder %v1203_v1, %v1211_v7  ;;  %vm306_vm3 = vcmp.lt.s32.totalorder %v269_v3, %v1211_v7  ;;  %vm307_vm6 = vcmp.lt.s32.totalorder %v270_v6, %v1211_v7  ;;  %vm308_vm9 = vcmp.lt.s32.totalorder %v271_v8, %v1211_v7  ;;  %s522_s22 = sshll.u32 %s186_s19, 4  ;;  %s1043_s27 = smov [#allocation5]   ;;  %s523_s22 = int_to_ptr.vmem [resolvable:$true] %s522_s22 }
  0x4b   : > { %vm321_vm4 = vmand %vm287_vm0, %vm305_vm2  ;;  %vm309_vm13 = vcmp.lt.s32.totalorder %v272_v9, %v1211_v7  ;;  %vm310_vm0 = vcmp.lt.s32.totalorder %v273_v10, %v1211_v7  ;;  %v276_v15 = vadd.s32 64, %v1203_v1  ;;  %v277_v18 = vadd.s32 72, %v1203_v1  ;;  %s898_s26 = scalar_lea.vmem %s523_s22, 128  ;;  %s902_s23 = sshll.u32 %s1043_s27, 4  ;;  %s903_s23 = int_to_ptr.vmem [resolvable:$false] %s902_s23 }
  0x4c   : > { %vm322_vm7 = vmand %vm288_vm1, %vm306_vm3  ;;  %vm293_vm3 = vcmp.ge.s32.totalorder %v274_v11, %v1206_v4  ;;  %v278_v19 = vadd.s32 80, %v1203_v1  ;;  %v1266_v23 = vmul.f32 %v206_v17, %v206_v17  ;;  %v279_v24 = vadd.s32 88, %v1203_v1  ;;  %p899_p8 = scmp.ne.s32.totalorder %s523_s22, %s898_s26  ;;  %s904_s28 = scalar_lea.vmem %s903_s23, 256 }
  0x4d   : > { %vm680_vm10 = vmpackc.low %vm322_vm7, %vm321_vm4  ;;  %vm311_vm4 = vcmp.lt.s32.totalorder %v274_v11, %v1211_v7  ;;  %vm312_vm7 = vcmp.lt.s32.totalorder %v275_v13, %v1211_v7  ;;  %v1286_v27 = vmul.f32 %v207_v20, %v207_v20  ;;  %v280_v29 = vadd.s32 96, %v1203_v1  ;;  %p905_p0 = scmp.lt.s32.totalorder %s523_s22, %s903_s23  ;;  %p906_p4 = scmp.lt.s32.totalorder %s904_s28, %s898_s26 }
  0x4e   : > { %731 = vmatprep.subr.msk.bf16.mxu0 %vm680_vm10, %v1041_v12  ;;  %vm323_vm11 = vmand %vm289_vm5, %vm307_vm6  ;;  %755 = vmatprep.subr.msk.bf16.mxu1 %vm680_vm10, %v1041_v12  ;;  %vm294_vm6 = vcmp.ge.s32.totalorder %v275_v13, %v1206_v4  ;;  %v230_v26 = vadd.f32 %v1266_v23, %v1264_v22  ;;  %v281_v30 = vadd.s32 104, %v1203_v1  ;;  %v1307_v32 = vmul.f32 %v208_v25, %v208_v25  ;;  %p900_p3 = pnand %p899_p8, %p1539_p1 }
  0x4f   : > { %732 = vmatpush3.bf16.msk.msra.mxu0 %vm680_vm10, %v1041_v12  ;;  %vm324_vm14 = vmand %vm290_vm8, %vm308_vm9  ;;  %763 = vmatpush3.bf16.msk.msra.mxu1 %vm680_vm10, %v1041_v12  ;;  %vm295_vm10 = vcmp.ge.s32.totalorder %v276_v15, %v1206_v4  ;;  %v282_v36 = vadd.s32 112, %v1203_v1  ;;  %v217_v37 = vmul.f32 %v209_v31, %v209_v31  ;;  %v283_v39 = vadd.s32 120, %v1203_v1  ;;  %p907_p7 = por %p906_p4, %p905_p0 }
  0x50   : > { %vm1234_vm1 = vmpackc.low %vm324_vm14, %vm323_vm11  ;;  %vm313_vm11 = vcmp.lt.s32.totalorder %v276_v15, %v1211_v7  ;;  %vm314_vm14 = vcmp.lt.s32.totalorder %v277_v18, %v1211_v7  ;;  %v231_v33 = vadd.f32 %v230_v26, %v1286_v27  ;;  %v218_v41 = vmul.f32 %v210_v34, %v210_v34  ;;  %p901_p5 = pneg %p900_p3 }
  0x51   : > { %733 = vmatprep.subr.msk.bf16.mxu0 %vm1234_vm1, %v1041_v12  ;;  %vm325_vm2 = vmand %vm291_vm12, %vm309_vm13  ;;  %756 = vmatprep.subr.msk.bf16.mxu1 %vm1234_vm1, %v1041_v12  ;;  %vm296_vm13 = vcmp.ge.s32.totalorder %v277_v18, %v1206_v4  ;;  %v219_v46 = vmul.f32 %v211_v40, %v211_v40  ;;  %v220_v48 = vmul.f32 %v212_v44, %v212_v44 }
  0x52   : > { %vm326_vm5 = vmand %vm292_vm15, %vm310_vm0  ;;  %vm297_vm0 = vcmp.ge.s32.totalorder %v278_v19, %v1206_v4  ;;  %v232_v38 = vadd.f32 %v231_v33, %v1307_v32  ;;  %p908_p10 = pnand %p907_p7, %p901_p5 }
  0x53   : > { %734 = vmatpush3.bf16.msk.msra.mxu0 %vm1234_vm1, %v1041_v12  ;;  %vm1257_vm8 = vmpackc.low %vm326_vm5, %vm325_vm2  ;;  %764 = vmatpush3.bf16.msk.msra.mxu1 %vm1234_vm1, %v1041_v12  ;;  %vm315_vm2 = vcmp.lt.s32.totalorder %v278_v19, %v1211_v7  ;;  %vm316_vm5 = vcmp.lt.s32.totalorder %v279_v24, %v1211_v7 }
  0x54   : > { %735 = vmatprep.subr.msk.bf16.mxu0 %vm1257_vm8, %v1041_v12  ;;  %vm327_vm9 = vmand %vm293_vm3, %vm311_vm4  ;;  %757 = vmatprep.subr.msk.bf16.mxu1 %vm1257_vm8, %v1041_v12  ;;  %vm298_vm4 = vcmp.ge.s32.totalorder %v279_v24, %v1206_v4  ;;  %v233_v42 = vadd.f32 %v232_v38, %v217_v37 }
  0x55   : > { %vm328_vm12 = vmand %vm294_vm6, %vm312_vm7 }
  0x56   : > { %vm1288_vm15 = vmpackc.low %vm328_vm12, %vm327_vm9  ;;  %vm300_vm9 = vcmp.ge.s32.totalorder %v281_v30, %v1206_v4  ;;  %vm318_vm12 = vcmp.lt.s32.totalorder %v281_v30, %v1211_v7  ;;  %v234_v45 = vadd.f32 %v233_v42, %v218_v41 }
  0x57   : > { %736 = vmatpush3.bf16.msk.msra.mxu0 %vm1257_vm8, %v1041_v12  ;;  %765 = vmatpush3.bf16.msk.msra.mxu1 %vm1257_vm8, %v1041_v12  ;;  %vm329_vm1 = vmand %vm295_vm10, %vm313_vm11  ;;  %vm299_vm8 = vcmp.ge.s32.totalorder %v280_v29, %v1206_v4  ;;  %vm317_vm10 = vcmp.lt.s32.totalorder %v280_v29, %v1211_v7 }
  0x58   : > { %737 = vmatprep.subr.msk.bf16.mxu0 %vm1288_vm15, %v1041_v12  ;;  %vm330_vm3 = vmand %vm296_vm13, %vm314_vm14  ;;  %758 = vmatprep.subr.msk.bf16.mxu1 %vm1288_vm15, %v1041_v12  ;;  %v235_v49 = vadd.f32 %v234_v45, %v219_v46 }
  0x59   : > { %vm1323_vm6 = vmpackc.low %vm330_vm3, %vm329_vm1  ;;  %vm320_vm3 = vcmp.lt.s32.totalorder %v283_v39, %v1211_v7 }
  0x5a   : > { %vm331_vm7 = vmand %vm297_vm0, %vm315_vm2  ;;  %vm319_vm0 = vcmp.lt.s32.totalorder %v282_v36, %v1211_v7  ;;  %vm302_vm2 = vcmp.ge.s32.totalorder %v283_v39, %v1206_v4  ;;  %v1382_v50 = vadd.f32 %v235_v49, %v220_v48 }
  0x5b   : > { %738 = vmatpush3.bf16.msk.msra.mxu0 %vm1288_vm15, %v1041_v12  ;;  %766 = vmatpush3.bf16.msk.msra.mxu1 %vm1288_vm15, %v1041_v12  ;;  %vm332_vm11 = vmand %vm298_vm4, %vm316_vm5  ;;  %vm301_vm15 = vcmp.ge.s32.totalorder %v282_v36, %v1206_v4 }
  0x5c   : > { %739 = vmatprep.subr.msk.bf16.mxu0 %vm1323_vm6, %v1041_v12  ;;  %vm1348_vm13 = vmpackc.low %vm332_vm11, %vm331_vm7  ;;  %759 = vmatprep.subr.msk.bf16.mxu1 %vm1323_vm6, %v1041_v12  ;;  %vm239_vm7 = vcmp.gt.f32.partialorder %v1264_v22, 0.0  ;;  %238 = vst [vmem:[%s186_s19] sm:$0xff] %v1382_v50 }
  0x5d   : > { %vm333_vm14 = vmand %vm299_vm8, %vm317_vm10  ;;  %vm240_vm8 = vcmp.gt.f32.partialorder %v1266_v23, 0.0  ;;  %vm244_vm10 = vcmp.gt.f32.partialorder %v218_v41, 0.0 }
  0x5e   : > { %vm334_vm1 = vmand %vm300_vm9, %vm318_vm12  ;;  %vm243_vm9 = vcmp.gt.f32.partialorder %v217_v37, 0.0 }
  0x5f   : > { %740 = vmatpush3.bf16.msk.msra.mxu0 %vm1323_vm6, %v1041_v12  ;;  %767 = vmatpush3.bf16.msk.msra.mxu1 %vm1323_vm6, %v1041_v12  ;;  %vm1370_vm4 = vmpackc.low %vm334_vm1, %vm333_vm14  ;;  %vm246_vm1 = vcmp.gt.f32.partialorder %v220_v48, 0.0 }
  0x60   : > { %741 = vmatprep.subr.msk.bf16.mxu0 %vm1348_vm13, %v1041_v12  ;;  %760 = vmatprep.subr.msk.bf16.mxu1 %vm1348_vm13, %v1041_v12  ;;  %vm335_vm5 = vmand %vm301_vm15, %vm319_vm0  ;;  %vm242_vm15 = vcmp.gt.f32.partialorder %v1307_v32, 0.0  ;;  %vm245_vm0 = vcmp.gt.f32.partialorder %v219_v46, 0.0 }
  0x61   : > { %vm336_vm6 = vmand %vm302_vm2, %vm320_vm3 }
  0x62   : > { %vm696_vm11 = vmpackc.low %vm240_vm8, %vm239_vm7  ;;  %vm475_vm7 = vcmask 31744  }
  0x63   : > { %742 = vmatpush3.bf16.msk.msra.mxu0 %vm1348_vm13, %v1041_v12  ;;  %768 = vmatpush3.bf16.msk.msra.mxu1 %vm1348_vm13, %v1041_v12  ;;  %vm694_vm12 = vmpackc.low %vm336_vm6, %vm335_vm5  ;;  %vm241_vm13 = vcmp.gt.f32.partialorder %v1286_v27, 0.0 }
  0x64   : > { %743 = vmatprep.subr.msk.bf16.mxu0 %vm1370_vm4, %v1041_v12  ;;  %761 = vmatprep.subr.msk.bf16.mxu1 %vm1370_vm4, %v1041_v12  ;;  %vm700_vm14 = vmpackc.low %vm244_vm10, %vm243_vm9 }
  0x65   : > { %747 = vmatprep.mubr.msk.bf16.mxu0 %vm696_vm11, %v1041_v12  ;;  %751 = vmatprep.mubr.msk.bf16.mxu1 %vm700_vm14, %v1041_v12  ;;  %vm698_vm2 = vmpackc.low %vm242_vm15, %vm241_vm13 }
  0x66   : > { %vm702_vm3 = vmpackc.low %vm246_vm1, %vm245_vm0 }
  0x67   : > { %744 = vmatpush3.bf16.msk.msra.mxu0 %vm1370_vm4, %v1041_v12  ;;  %769 = vmatpush3.bf16.msk.msra.mxu1 %vm1370_vm4, %v1041_v12 }
  0x68   : > { %745 = vmatprep.subr.msk.bf16.mxu0 %vm694_vm12, %v1041_v12  ;;  %762 = vmatprep.subr.msk.bf16.mxu1 %vm694_vm12, %v1041_v12 }
  0x6b   : > { %746 = vmatpush3.bf16.msk.msra.mxu0 %vm694_vm12, %v1041_v12  ;;  %770 = vmatpush3.bf16.msk.msra.mxu1 %vm694_vm12, %v1041_v12 }
  0x6e   : > { %748 = vmatmul.mubr.msk.bf16.vlgmr.msra.gmra.mrb[0].mxu0 %vm698_vm2, %v1041_v12  ;;  %752 = vmatmul.mubr.msk.bf16.vlgmr.msra.gmra.mrb[0].mxu1 %vm702_vm3, %v1041_v12 }
 0x141   : > { %v749_v51 = vpop.f32.mrb[0].mxu0  ;;  %v753_v52 = vpop.f32.mrb[0].mxu1 }
 0x142   : > { %v411_v53 = vpop.f32.mrb[1].mxu0  ;;  %v427_v54 = vpop.f32.mrb[1].mxu1  ;;  %vm444_vm4 = vcmp.gt.f32.partialorder %v749_v51, 0.0  ;;  %vm448_vm11 = vcmp.gt.f32.partialorder %v753_v52, 0.0 }
 0x143   : > { %vm442_vm5 = vcmp.gt.f32.partialorder %v411_v53, 0.0  ;;  %v750_v55 = vpop.f32.mrb[2].mxu0  ;;  %v754_v56 = vpop.f32.mrb[2].mxu1  ;;  %vm446_vm9 = vcmp.gt.f32.partialorder %v427_v54, 0.0  ;;  %v706_v61 = vsel %vm444_vm4, 1.0, %v1042_v57  ;;  %v710_v10 = vsel %vm448_vm11, 1.0, %v1042_v57 }
 0x144   : > { %v704_v58 = vsel %vm442_vm5, 1.0, %v1042_v57  ;;  %v414_v59 = vpop.f32.mrb[3].mxu0  ;;  %v430_v60 = vpop.f32.mrb[3].mxu1  ;;  %vm445_vm8 = vcmp.gt.f32.partialorder %v750_v55, 0.0  ;;  %v708_v3 = vsel %vm446_vm9, 1.0, %v1042_v57  ;;  %v479_v4 = vsel %vm475_vm7, %v706_v61, 0.0 }
 0x145   : > { %vm443_vm6 = vcmp.gt.f32.partialorder %v414_v59, 0.0  ;;  %v476_v63 = vsel %vm475_vm7, %v704_v58, 0.0  ;;  %v707_v1 = vsel %vm445_vm8, 1.0, %v1042_v57  ;;  %vm447_vm10 = vcmp.gt.f32.partialorder %v430_v60, 0.0 }
 0x146   : > { %v705_v62 = vsel %vm443_vm6, 1.0, %v1042_v57  ;;  %v481_v6 = vsel %vm475_vm7, %v707_v1, 0.0  ;;  %v483_v7 = vsel %vm475_vm7, %v708_v3, 0.0  ;;  %v709_v9 = vsel %vm447_vm10, 1.0, %v1042_v57 }
 0x147   : > { %v477_v0 = vsel %vm475_vm7, %v705_v62, 0.0  ;;  %vm449_vm12 = vcmp.gt.f32.partialorder %v754_v56, 0.0  ;;  %v485_v12 = vsel %vm475_vm7, %v709_v9, 0.0  ;;  %v487_v15 = vsel %vm475_vm7, %v710_v10, 0.0 }
 0x148   : > { %v478_v2 = vadd.f32 %v477_v0, %v476_v63  ;;  %v711_v13 = vsel %vm449_vm12, 1.0, %v1042_v57 }
 0x149   : > { %v489_v17 = vsel %vm475_vm7, %v711_v13, 0.0 }
 0x14a   : > { %v480_v5 = vadd.f32 %v479_v4, %v478_v2 }
 0x14c   : > { %v482_v8 = vadd.f32 %v481_v6, %v480_v5 }
 0x14e   : > { %v484_v11 = vadd.f32 %v483_v7, %v482_v8 }
 0x150   : > { %v486_v14 = vadd.f32 %v485_v12, %v484_v11 }
 0x152   : > { %v488_v16 = vadd.f32 %v487_v15, %v486_v14 }
 0x154   : > { %v490_v18 = vadd.f32 %v489_v17, %v488_v16 }
 0x156   : > { %491 = vadd.xlane.f32.xlu0 %v490_v18 }
 0x157   : > { %911 = shalt.err (!%p908_p10)
}
 0x158   : > { %s912_s6 = scalar_lea.hbm %s1433_s12, 128  ;;  %s916_s5 = scalar_lea.hbm %s1519_s1, 256 }
 0x159   : > { %p913_p6 = scmp.ne.s32.totalorder %s1433_s12, %s912_s6  ;;  %p917_p2 = scmp.lt.u32.totalorder %s1433_s12, %s1519_s1 }
 0x15a   : > { %p918_p9 = scmp.lt.u32.totalorder %s916_s5, %s912_s6  ;;  %p920_p8 = scmp.lt.u32.totalorder %s912_s6, %s1433_s12 }
 0x15b   : > { %p914_p12 = pnand %p913_p6, %p1539_p1 }
 0x15c   : > { %p919_p11 = por %p918_p9, %p917_p2 }
 0x15d   : > { %p915_p13 = pneg %p914_p12 }
 0x15e   : > { %p921_p3 = por %p920_p8, %p919_p11 }
 0x160   : > { %p922_p5 = pnand %p921_p3, %p915_p13 }
 0x162   : > { %925 = shalt.err (!%p922_p5)
}
 0x163   : > { %775 = dma.vmem_to_hbm [thread:$0]  (%p1539_p1), %s523_s22, 128, %s1433_s12, %s504_s18  }
 0x164   : > { %s193_s26 = scalar_lea.vmem [#allocation6], %s654_s21  ;;  %s1460_s22 = scalar_lea.hbm %s1520_s2, %s714_s24 }
 0x165   : > { %s535_s23 = sshll.u32 %s193_s26, 4  ;;  %s509_s12 = scalar_lea.sflag [#allocation7], %s1421_s25  ;;  %s1462_s23 = int_to_ptr.vmem [resolvable:$true] %s535_s23 }
 0x166   : > { %s926_s18 = scalar_lea.vmem %s1462_s23, 128  ;;  %s1044_s21 = smov [#allocation6]  }
 0x167   : > { %p927_p0 = scmp.ne.s32.totalorder %s1462_s23, %s926_s18  ;;  %s930_s19 = sshll.u32 %s1044_s21, 4  ;;  %s931_s19 = int_to_ptr.vmem [resolvable:$false] %s930_s19 }
 0x168   : > { %s932_s15 = scalar_lea.vmem %s931_s19, 256  ;;  %p933_p10 = scmp.lt.s32.totalorder %s1462_s23, %s931_s19 }
 0x169   : > { %p928_p4 = pnand %p927_p0, %p1539_p1  ;;  %p934_p6 = scmp.lt.s32.totalorder %s932_s15, %s926_s18 }
 0x16b   : > { %p929_p7 = pneg %p928_p4  ;;  %p935_p12 = por %p934_p6, %p933_p10 }
 0x16d   : > { %p936_p13 = pnand %p935_p12, %p929_p7 }
 0x1e3   : > { %v492_v19 = vpop.xlane.xlu0 %491 }
 0x1e4   : > { %v493_v20 = vrot.slane %v492_v19, 4 }
 0x1e6   : > { %v494_v21 = vadd.f32 %v493_v20, %v492_v19 }
 0x1e8   : > { %v495_v22 = vrot.slane %v494_v21, 2 }
 0x1ea   : > { %v496_v23 = vadd.f32 %v495_v22, %v494_v21 }
 0x1ec   : > { %v497_v24 = vrot.slane %v496_v23, 1 }
 0x1ee   : > { %v498_v25 = vadd.f32 %v497_v24, %v496_v23 }
 0x1f0   : > { %771 = vpush %v498_v25 }
 0x221   : > { %s772_s28 = spop %771 }
 0x222   : > { %v500_v26 = vstv %s772_s28 }
 0x223   : > { %502 = vst [vmem:[%s193_s26] sm:$0xff] %v500_v26 }
 0x224   : > { %939 = shalt.err (!%p936_p13)
}
 0x225   : > { %s940_s25 = scalar_lea.hbm %s1460_s22, 128  ;;  %s944_s8 = scalar_lea.hbm %s1520_s2, 256 }
 0x226   : > { %p941_p2 = scmp.ne.s32.totalorder %s1460_s22, %s940_s25  ;;  %p945_p8 = scmp.lt.u32.totalorder %s1460_s22, %s1520_s2 }
 0x227   : > { %p946_p3 = scmp.lt.u32.totalorder %s944_s8, %s940_s25  ;;  %p948_p0 = scmp.lt.u32.totalorder %s940_s25, %s1460_s22 }
 0x228   : > { %p942_p9 = pnand %p941_p2, %p1539_p1 }
 0x229   : > { %p947_p5 = por %p946_p3, %p945_p8 }
 0x22a   : > { %p943_p11 = pneg %p942_p9 }
 0x22b   : > { %p949_p4 = por %p948_p0, %p947_p5 }
 0x22d   : > { %p950_p7 = pnand %p949_p4, %p943_p11 }
 0x22f   : > { %953 = shalt.err (!%p950_p7)
}
 0x230   : > { %776 = dma.vmem_to_hbm [thread:$0]  (%p1539_p1), %s1462_s23, 128, %s1460_s22, %s509_s12  }
 0x231 PF: > { %s547_s28 = sand.u32 1, %s1004_s9   ;;  %p1540_p10 = scmp.ne.s32.totalorder %s1525_s4, 0 }
 0x232   : > { %p1541_p6 = scmp.ge.s32.totalorder %s1036_s17, 2  ;;  %s548_s6 = scalar_lea.sflag [#allocation4], %s547_s28 }
 0x234   : > { %p784_p12 = pnand %p1541_p6, %p1540_p10 }
 0x236   : > { %995 = dma.done.wait (!%p784_p12), %s548_s6, 128  }
 0x237   : > { %997 = vsyncadd (!%p784_p12), %s548_s6, 4294967168  ;;  %s557_s7 = scalar_lea.sflag [#allocation7], %s547_s28 }
 0x238   : > { %999 = dma.done.wait (!%p784_p12), %s557_s7, 128  }
 0x239   : > { %1001 = vsyncadd (!%p784_p12), %s557_s7, 4294967168  ;;  %s22_s17 = sadd.s32 1, %s1036_s17   ;;  %s1542_s9 = smov %s1008_s10 }
 0x23a   : > { %p19_p13 = scmp.ge.s32.totalorder %s22_s17, 4   ;;  %s1543_s10 = smov %s1012_s11 }
 0x23b   : > { %s1544_s11 = smov %s1132_s29  ;;  %s1545_s12 = smov %s1020_s13 }
 0x23c   : > { %s1546_s13 = smov %s1024_s14  ;;  %s1547_s14 = smov %s1135_s30 }
 0x23d   : > { %s1548_s15 = smov %s1032_s16  ;;  %s1549_s16 = smov %s1551_s20 }
 0x23e   :  { %21 = sbr.rel (!%p19_p13) target bundleno = 10 (0xa), region = 90 }
 0x245   :  { %562 = vsyncpa [#allocation3], 1 }
 0x246   :  { %564 = vsyncpa [#allocation3 + $0x1], 1 }
 0x247   :  { %565 = vsyncpa [#allocation4], 1 }
 0x248   :  { %567 = vsyncpa [#allocation4 + $0x1], 1 }
 0x249   :  { %568 = vsyncpa [#allocation7], 1 }
 0x24a   :  { %570 = vsyncpa [#allocation7 + $0x1], 1 }

</bundles_post_ra>
